<compile_context>
chip_gen: v6e
topology: v6e:2x2x1
jax: 0.10.0
libtpu: 0.0.40
codegen_flags: <defaults>
</compile_context>

<pallas_src>
import jax
import jax.numpy as jnp
from jax.experimental import pallas as pl
from jax.experimental.pallas import tpu as pltpu

IN_DIM = 28 * 28   # 784
K_PAD = 896        # 784 padded to a multiple of 128 (clean MXU K passes)
HID = 512
OUT_DIM = 10
N_PAD = 128        # lane-dense output (avoid masked stores on a 10-wide tile)


def _round_up(x, m):
    return (x + m - 1) // m * m


def mlp_kernel(x_ref, w1_ref, b1_ref, w2_ref, b2_ref, o_ref):
    # x_ref:  (TILE_B, K_PAD) bf16    w1_ref: (K_PAD, HID)  bf16   b1_ref: (1, HID)   f32
    # w2_ref: (HID, N_PAD)    bf16    b2_ref: (1, N_PAD)    f32    o_ref:  (TILE_B, N_PAD) f32
    x = x_ref[...]
    h = jnp.dot(x, w1_ref[...], preferred_element_type=jnp.float32) + b1_ref[...]
    h = h.astype(jnp.bfloat16)  # bf16 feed for the second MXU pass, f32 accumulate below
    y = jnp.dot(h, w2_ref[...], preferred_element_type=jnp.float32) + b2_ref[...]
    o_ref[...] = y


def pack_params(w1, b1, w2, b2):
    """One-time repack: zero-pad + bf16 cast of the matmul operands.
    w1: (784, 512), b1: (1, 512), w2: (512, 10), b2: (1, 10)."""
    w1_p = jnp.zeros((K_PAD, HID), jnp.bfloat16).at[:IN_DIM, :].set(
        w1.astype(jnp.bfloat16))
    w2_p = jnp.zeros((HID, N_PAD), jnp.bfloat16).at[:, :OUT_DIM].set(
        w2.astype(jnp.bfloat16))
    b1_p = b1.reshape(1, HID).astype(jnp.float32)
    b2_p = jnp.zeros((1, N_PAD), jnp.float32).at[:, :OUT_DIM].set(
        b2.reshape(1, OUT_DIM).astype(jnp.float32))
    return w1_p, b1_p, w2_p, b2_p


def mlp_forward(x_nchw, w1_p, b1_p, w2_p, b2_p, *, tile_b=256):
    """x_nchw: (B, 1, 28, 28) float32; packed params from pack_params().
    Returns logits (B, 10) float32."""
    B = x_nchw.shape[0]
    x_flat = x_nchw.reshape(B, -1)                        # == inputs.view(B, -1)

    tile_b = min(tile_b, _round_up(B, 8))
    b_pad = _round_up(B, tile_b)

    # Zero-pad batch/K and cast activations to bf16 (fuses with the pallas_call under jit).
    x_p = jnp.zeros((b_pad, K_PAD), jnp.bfloat16).at[:B, :IN_DIM].set(
        x_flat.astype(jnp.bfloat16))

    grid = (b_pad // tile_b,)
    flops = 2 * b_pad * (K_PAD * HID + HID * N_PAD)
    bytes_accessed = (x_p.size * 2 + w1_p.size * 2 + w2_p.size * 2
                      + b1_p.size * 4 + b2_p.size * 4 + b_pad * N_PAD * 4)

    out = pl.pallas_call(
        mlp_kernel,
        out_shape=jax.ShapeDtypeStruct((b_pad, N_PAD), jnp.float32),
        grid_spec=pltpu.PrefetchScalarGridSpec(
            num_scalar_prefetch=0,
            grid=grid,
            in_specs=[
                pl.BlockSpec((tile_b, K_PAD), lambda i: (i, 0)),  # x: tiled over batch
                pl.BlockSpec((K_PAD, HID), lambda i: (0, 0)),     # w1: resident in VMEM
                pl.BlockSpec((1, HID), lambda i: (0, 0)),         # b1: resident
                pl.BlockSpec((HID, N_PAD), lambda i: (0, 0)),     # w2: resident
                pl.BlockSpec((1, N_PAD), lambda i: (0, 0)),       # b2: resident
            ],
            out_specs=pl.BlockSpec((tile_b, N_PAD), lambda i: (i, 0)),
        ),
        compiler_params=pltpu.CompilerParams(
            dimension_semantics=("parallel",),   # batch axis -> both TCs on v7x
        ),
        cost_estimate=pl.CostEstimate(
            flops=flops, transcendentals=0, bytes_accessed=bytes_accessed),
    )(x_p, w1_p, b1_p, w2_p, b2_p)

    return out[:B, :OUT_DIM]


def init_params(key):
    """Deterministic params. PyTorch nn.Linear stores weight as (out, in);
    we keep the transposed (in, out) layout so the kernel does x @ W."""
    in_dim, hid_dim, out_dim = IN_DIM, HID, OUT_DIM
    k1, k2, k3, k4 = jax.random.split(key, 4)
    bound1 = 1.0 / jnp.sqrt(in_dim)
    bound2 = 1.0 / jnp.sqrt(hid_dim)
    w1 = jax.random.uniform(k1, (in_dim, hid_dim), jnp.float32, -bound1, bound1)
    b1 = jax.random.uniform(k2, (1, hid_dim), jnp.float32, -bound1, bound1)
    w2 = jax.random.uniform(k3, (hid_dim, out_dim), jnp.float32, -bound2, bound2)
    b2 = jax.random.uniform(k4, (1, out_dim), jnp.float32, -bound2, bound2)
    return w1, b1, w2, b2


if __name__ == "__main__":
    key = jax.random.PRNGKey(0)
    k_x, k_p = jax.random.split(key)

    B = 8
    x = jax.random.normal(k_x, (B, 1, 28, 28), jnp.float32)  # NCHW like PyTorch
    w1, b1, w2, b2 = init_params(k_p)

    packed = pack_params(w1, b1, w2, b2)           # one-time weight repack
    forward = jax.jit(mlp_forward)                 # pad/cast of x fuses with the kernel

    logits = forward(x, *packed)
    logits = jax.block_until_ready(logits)

    # Pure-JAX f32 reference; bf16 matmul operands => loosened tolerance.
    ref = (x.reshape(B, -1) @ w1 + b1) @ w2 + b2
    assert logits.shape == (B, 10)
    assert jnp.allclose(logits, ref, atol=5e-2, rtol=5e-2), (
        float(jnp.max(jnp.abs(logits - ref))))

    print("KERNEL_OK")
</pallas_src>

<mosaic_0001>
module attributes {stable_mosaic.version = 11 : i64} {
  func.func @mlp_kernel(%arg0: i32, %arg1: memref<8x896xbf16, #tpu.memory_space<vmem>>, %arg2: memref<896x512xbf16, #tpu.memory_space<vmem>>, %arg3: memref<1x512xf32, #tpu.memory_space<vmem>>, %arg4: memref<512x128xbf16, #tpu.memory_space<vmem>>, %arg5: memref<1x128xf32, #tpu.memory_space<vmem>>, %arg6: memref<8x128xf32, #tpu.memory_space<vmem>>) attributes {dimension_semantics = [#tpu.dimension_semantics<parallel>], iteration_bounds = array<i64: 1>, scalar_prefetch = 0 : i64, scratch_operands = 0 : i64, tpu.core_type = #tpu.core_type<tc>, window_params = [{transform_indices = @transform_0, window_bounds = array<i64: 8, 896>}, {pipeline_mode = #tpu.pipeline_mode<synchronous>, transform_indices = @transform_1, window_bounds = array<i64: 896, 512>}, {pipeline_mode = #tpu.pipeline_mode<synchronous>, transform_indices = @transform_2, window_bounds = array<i64: 1, 512>}, {pipeline_mode = #tpu.pipeline_mode<synchronous>, transform_indices = @transform_3, window_bounds = array<i64: 512, 128>}, {pipeline_mode = #tpu.pipeline_mode<synchronous>, transform_indices = @transform_4, window_bounds = array<i64: 1, 128>}, {transform_indices = @transform_5, window_bounds = array<i64: 8, 128>}]} {
    %c0 = arith.constant 0 : index
    %c0_0 = arith.constant 0 : index
    %0 = vector.load %arg1[%c0, %c0_0] : memref<8x896xbf16, #tpu.memory_space<vmem>>, vector<8x896xbf16>
    %c0_1 = arith.constant 0 : index
    %c0_2 = arith.constant 0 : index
    %1 = vector.load %arg2[%c0_1, %c0_2] : memref<896x512xbf16, #tpu.memory_space<vmem>>, vector<896x512xbf16>
    %cst = arith.constant dense<0.000000e+00> : vector<8x512xf32>
    %2 = tpu.matmul %0, %1, %cst {dimension_numbers = #tpu.dot_dimension_numbers<[1], [0], [0], [1], [0, 0, 1, 1], [], []>} : vector<8x896xbf16>, vector<896x512xbf16>, vector<8x512xf32> -> vector<8x512xf32>
    %c0_3 = arith.constant 0 : index
    %c0_4 = arith.constant 0 : index
    %3 = vector.load %arg3[%c0_3, %c0_4] : memref<1x512xf32, #tpu.memory_space<vmem>>, vector<1x512xf32>
    %4 = vector.broadcast %3 : vector<1x512xf32> to vector<8x512xf32>
    %5 = arith.addf %2, %4 : vector<8x512xf32>
    %6 = arith.truncf %5 : vector<8x512xf32> to vector<8x512xbf16>
    %c0_5 = arith.constant 0 : index
    %c0_6 = arith.constant 0 : index
    %7 = vector.load %arg4[%c0_5, %c0_6] : memref<512x128xbf16, #tpu.memory_space<vmem>>, vector<512x128xbf16>
    %cst_7 = arith.constant dense<0.000000e+00> : vector<8x128xf32>
    %8 = tpu.matmul %6, %7, %cst_7 {dimension_numbers = #tpu.dot_dimension_numbers<[1], [0], [0], [1], [0, 0, 1, 1], [], []>} : vector<8x512xbf16>, vector<512x128xbf16>, vector<8x128xf32> -> vector<8x128xf32>
    %c0_8 = arith.constant 0 : index
    %c0_9 = arith.constant 0 : index
    %9 = vector.load %arg5[%c0_8, %c0_9] : memref<1x128xf32, #tpu.memory_space<vmem>>, vector<1x128xf32>
    %10 = vector.broadcast %9 : vector<1x128xf32> to vector<8x128xf32>
    %11 = arith.addf %8, %10 : vector<8x128xf32>
    %c0_10 = arith.constant 0 : index
    %c0_11 = arith.constant 0 : index
    %12 = vector.load %arg6[%c0_10, %c0_11] : memref<8x128xf32, #tpu.memory_space<vmem>>, vector<8x128xf32>
    tpu.vector_store %arg6[%c0_10, %c0_11], %11 {strides = array<i32>} : memref<8x128xf32, #tpu.memory_space<vmem>>, vector<8x128xf32>,
    return
  }
  func.func @transform_0(%arg0: i32) -> (i32, i32) {
    %c0_i32 = arith.constant 0 : i32
    %c0_i32_0 = arith.constant 0 : i32
    return %arg0, %c0_i32 : i32, i32
  }
  func.func @transform_1(%arg0: i32) -> (i32, i32) {
    %c0_i32 = arith.constant 0 : i32
    %c0_i32_0 = arith.constant 0 : i32
    %c0_i32_1 = arith.constant 0 : i32
    return %c0_i32, %c0_i32_0 : i32, i32
  }
  func.func @transform_2(%arg0: i32) -> (i32, i32) {
    %c0_i32 = arith.constant 0 : i32
    %c0_i32_0 = arith.constant 0 : i32
    %c0_i32_1 = arith.constant 0 : i32
    return %c0_i32, %c0_i32_0 : i32, i32
  }
  func.func @transform_3(%arg0: i32) -> (i32, i32) {
    %c0_i32 = arith.constant 0 : i32
    %c0_i32_0 = arith.constant 0 : i32
    %c0_i32_1 = arith.constant 0 : i32
    return %c0_i32, %c0_i32_0 : i32, i32
  }
  func.func @transform_4(%arg0: i32) -> (i32, i32) {
    %c0_i32 = arith.constant 0 : i32
    %c0_i32_0 = arith.constant 0 : i32
    %c0_i32_1 = arith.constant 0 : i32
    return %c0_i32, %c0_i32_0 : i32, i32
  }
  func.func @transform_5(%arg0: i32) -> (i32, i32) {
    %c0_i32 = arith.constant 0 : i32
    %c0_i32_0 = arith.constant 0 : i32
    return %arg0, %c0_i32 : i32, i32
  }
}

</mosaic_0001>

<bundles_post_ra>
// kernel: mlp_forward.1
= control target key start
LH: loop header
LB: loop body
LE: loop exit
PB: predicated region body
PF: predicated region fallthrough
CT: control target
= control target key end

     0   :  { %10 = vsyncpa [#allocation3], 0  ;;  %s3045_s0 = inlined_call_operand.vmem [shape: bf16[8,896], index: 0, kind: input, shape index: {}]   ;;  %s3046_s1 = inlined_call_operand.hbm [shape: bf16[896,512], index: 1, kind: input, shape index: {}]   ;;  %s3047_s2 = inlined_call_operand.vmem [shape: f32[1,512], index: 2, kind: input, shape index: {}]   ;;  %s3048_s3 = inlined_call_operand.vmem [shape: bf16[512,128], index: 3, kind: input, shape index: {}]   ;;  %s3049_s4 = inlined_call_operand.vmem [shape: f32[1,128], index: 4, kind: input, shape index: {}]   ;;  %s3050_s5 = inlined_call_operand.hbm [shape: f32[8,128], index: 5, kind: output, shape index: {}]  }
   0x1   :  { %11 = vsyncpa [#allocation4], 0  ;;  %s2854_s18 = smov [#allocation2]  }
   0x2   :  { %s19_s19 = sshll.u32 %s2854_s18, 4  ;;  %s20_s19 = int_to_ptr.vmem [resolvable:$true] %s19_s19 }
   0x3   :  { %s2818_s20 = scalar_lea.vmem %s20_s19, 28672  ;;  %p2823_p1 = scmp.lt.s32.totalorder %s20_s19, %s20_s19 }
   0x4   :  { %p2819_p0 = scmp.ne.s32.totalorder %s20_s19, %s2818_s20  ;;  %p2824_p2 = scmp.lt.s32.totalorder %s2818_s20, %s2818_s20 }
   0x6   :  { %p2825_p3 = por %p2824_p2, %p2823_p1 }
   0x8   :  { %p2826_p4 = pnand %p2825_p3, %p2819_p0 }
   0xa   :  { %2829 = shalt.err (!%p2826_p4)
}
   0xb   :  { %s2855_s21 = smov 256   ;;  %s2856_s22 = smov 16  }
   0xc   :  { %25 = dma.hbm_to_vmem [thread:$0]  %s3046_s1, 28672, %s20_s19, [#allocation3], %s2855_s21, %s2855_s21, %s2856_s22  }
   0xd   :  { %2850 = dma.done.wait [#allocation3], 28672  }
   0xe   :  { %2851 = vsyncadd [#allocation3], 4294938624  ;;  %v2435_v0 = vld [vmem:[#allocation2 + $0xe4] ss:$16 sps:$4 sm:$0xff]   ;;  %v2439_v2 = vld [vmem:[#allocation2 + $0xe0] ss:$16 sps:$4 sm:$0xff]  }
   0xf   :  { %v2437_v1 = vld [vmem:[#allocation2 + $0x2e4] ss:$16 sps:$4 sm:$0xff]   ;;  %1431 = vmatprep.subr.bf16.mxu0 %v2435_v0  ;;  %v2440_v3 = vld [vmem:[#allocation2 + $0x2e0] ss:$16 sps:$4 sm:$0xff]   ;;  %v37_v48 = vld [vmem:[%s3045_s0 + $0x8] sm:$0xff]  ;;  %s2858_s18 = smov [#allocation5]  }
  0x10   :  { %1472 = vmatprep.subr.bf16.mxu1 %v2437_v1  ;;  %v2441_v4 = vld [vmem:[#allocation2 + $0xc4] ss:$16 sps:$4 sm:$0xff]   ;;  %1432 = vmatpush1.bf16.msra.mxu0 %v2439_v2  ;;  %v2445_v6 = vld [vmem:[#allocation2 + $0xc0] ss:$16 sps:$4 sm:$0xff]   ;;  %v2900_v51 = vcombine.high %v37_v48, %v37_v48  ;;  %s2113_s19 = sshll.u32 %s2858_s18, 4  ;;  %s2114_s19 = int_to_ptr.vmem [resolvable:$true] %s2113_s19 }
  0x11   :  { %1473 = vmatpush1.bf16.msra.mxu1 %v2440_v3  ;;  %v2443_v5 = vld [vmem:[#allocation2 + $0x2c4] ss:$16 sps:$4 sm:$0xff]   ;;  %1433 = vmatprep.subr.bf16.mxu0 %v2441_v4  ;;  %v2446_v7 = vld [vmem:[#allocation2 + $0x2c0] ss:$16 sps:$4 sm:$0xff]   ;;  %s2830_s20 = scalar_lea.vmem %s2114_s19, 128  ;;  %p2835_p6 = scmp.lt.s32.totalorder %s2114_s19, %s2114_s19 }
  0x12   :  { %1474 = vmatprep.subr.bf16.mxu1 %v2443_v5  ;;  %v2447_v8 = vld [vmem:[#allocation2 + $0xa4] ss:$16 sps:$4 sm:$0xff]   ;;  %v2451_v10 = vld [vmem:[#allocation2 + $0xa0] ss:$16 sps:$4 sm:$0xff]   ;;  %1504 = vmatprep.mubr.bf16.mxu1 %v2900_v51  ;;  %p2831_p5 = scmp.ne.s32.totalorder %s2114_s19, %s2830_s20  ;;  %p2836_p7 = scmp.lt.s32.totalorder %s2830_s20, %s2830_s20 }
  0x13   :  { %v2449_v9 = vld [vmem:[#allocation2 + $0x2a4] ss:$16 sps:$4 sm:$0xff]   ;;  %v2452_v11 = vld [vmem:[#allocation2 + $0x2a0] ss:$16 sps:$4 sm:$0xff]  }
  0x14   :  { %1434 = vmatpush1.bf16.msra.mxu0 %v2445_v6  ;;  %v2453_v12 = vld [vmem:[#allocation2 + $0x84] ss:$16 sps:$4 sm:$0xff]   ;;  %v2457_v14 = vld [vmem:[#allocation2 + $0x80] ss:$16 sps:$4 sm:$0xff]   ;;  %p2837_p8 = por %p2836_p7, %p2835_p6 }
  0x15   :  { %1475 = vmatpush1.bf16.msra.mxu1 %v2446_v7  ;;  %1435 = vmatprep.subr.bf16.mxu0 %v2447_v8  ;;  %v2455_v13 = vld [vmem:[#allocation2 + $0x284] ss:$16 sps:$4 sm:$0xff]   ;;  %v2458_v15 = vld [vmem:[#allocation2 + $0x280] ss:$16 sps:$4 sm:$0xff]   ;;  %v2906_v7 = vcombine.low %v37_v48, %v37_v48  ;;  %v2595_v48 = vld [vmem:[#allocation2 + $0xcc] ss:$16 sps:$4 sm:$0xff]  }
  0x16   :  { %1476 = vmatprep.subr.bf16.mxu1 %v2449_v9  ;;  %v2459_v16 = vld [vmem:[#allocation2 + $0x64] ss:$16 sps:$4 sm:$0xff]   ;;  %v2463_v18 = vld [vmem:[#allocation2 + $0x60] ss:$16 sps:$4 sm:$0xff]   ;;  %p2838_p9 = pnand %p2837_p8, %p2831_p5 }
  0x17   :  { %v2461_v17 = vld [vmem:[#allocation2 + $0x264] ss:$16 sps:$4 sm:$0xff]   ;;  %v2464_v19 = vld [vmem:[#allocation2 + $0x260] ss:$16 sps:$4 sm:$0xff]  }
  0x18   :  { %1436 = vmatpush1.bf16.msra.mxu0 %v2451_v10  ;;  %v2465_v20 = vld [vmem:[#allocation2 + $0x44] ss:$16 sps:$4 sm:$0xff]   ;;  %v2469_v22 = vld [vmem:[#allocation2 + $0x40] ss:$16 sps:$4 sm:$0xff]  }
  0x19   :  { %1477 = vmatpush1.bf16.msra.mxu1 %v2452_v11  ;;  %1437 = vmatprep.subr.bf16.mxu0 %v2453_v12  ;;  %v2467_v21 = vld [vmem:[#allocation2 + $0x244] ss:$16 sps:$4 sm:$0xff]   ;;  %v2470_v23 = vld [vmem:[#allocation2 + $0x240] ss:$16 sps:$4 sm:$0xff]  }
  0x1a   :  { %1478 = vmatprep.subr.bf16.mxu1 %v2455_v13  ;;  %v2471_v24 = vld [vmem:[#allocation2 + $0x24] ss:$16 sps:$4 sm:$0xff]   ;;  %v2475_v26 = vld [vmem:[#allocation2 + $0x20] ss:$16 sps:$4 sm:$0xff]  }
  0x1b   :  { %v2473_v25 = vld [vmem:[#allocation2 + $0x224] ss:$16 sps:$4 sm:$0xff]   ;;  %v2476_v27 = vld [vmem:[#allocation2 + $0x220] ss:$16 sps:$4 sm:$0xff]  }
  0x1c   :  { %1438 = vmatpush1.bf16.msra.mxu0 %v2457_v14  ;;  %v2477_v28 = vld [vmem:[#allocation2 + $0x4] ss:$16 sps:$4 sm:$0xff]   ;;  %v2481_v30 = vld [vmem:[#allocation2] ss:$16 sps:$4 sm:$0xff]  }
  0x1d   :  { %1479 = vmatpush1.bf16.msra.mxu1 %v2458_v15  ;;  %1439 = vmatprep.subr.bf16.mxu0 %v2459_v16  ;;  %v2479_v29 = vld [vmem:[#allocation2 + $0x204] ss:$16 sps:$4 sm:$0xff]   ;;  %v2482_v31 = vld [vmem:[#allocation2 + $0x200] ss:$16 sps:$4 sm:$0xff]   ;;  %v2857_v16 = vmov 0  }
  0x1e   :  { %1480 = vmatprep.subr.bf16.mxu1 %v2461_v17  ;;  %v2483_v32 = vld [vmem:[#allocation2 + $0x1e4] ss:$16 sps:$4 sm:$0xff]   ;;  %v2487_v34 = vld [vmem:[#allocation2 + $0x1e0] ss:$16 sps:$4 sm:$0xff]  }
  0x1f   :  { %v2485_v33 = vld [vmem:[#allocation2 + $0x3e4] ss:$16 sps:$4 sm:$0xff]   ;;  %v2488_v35 = vld [vmem:[#allocation2 + $0x3e0] ss:$16 sps:$4 sm:$0xff]  }
  0x20   :  { %1440 = vmatpush1.bf16.msra.mxu0 %v2463_v18  ;;  %v2489_v36 = vld [vmem:[#allocation2 + $0x1c4] ss:$16 sps:$4 sm:$0xff]   ;;  %v2493_v38 = vld [vmem:[#allocation2 + $0x1c0] ss:$16 sps:$4 sm:$0xff]  }
  0x21   :  { %1481 = vmatpush1.bf16.msra.mxu1 %v2464_v19  ;;  %1441 = vmatprep.subr.bf16.mxu0 %v2465_v20  ;;  %v2491_v37 = vld [vmem:[#allocation2 + $0x3c4] ss:$16 sps:$4 sm:$0xff]   ;;  %v2494_v39 = vld [vmem:[#allocation2 + $0x3c0] ss:$16 sps:$4 sm:$0xff]  }
  0x22   :  { %1482 = vmatprep.subr.bf16.mxu1 %v2467_v21  ;;  %v2495_v40 = vld [vmem:[#allocation2 + $0x1a4] ss:$16 sps:$4 sm:$0xff]   ;;  %v2499_v42 = vld [vmem:[#allocation2 + $0x1a0] ss:$16 sps:$4 sm:$0xff]  }
  0x23   :  { %v2497_v41 = vld [vmem:[#allocation2 + $0x3a4] ss:$16 sps:$4 sm:$0xff]   ;;  %v2500_v43 = vld [vmem:[#allocation2 + $0x3a0] ss:$16 sps:$4 sm:$0xff]  }
  0x24   :  { %1442 = vmatpush1.bf16.msra.mxu0 %v2469_v22  ;;  %v2501_v44 = vld [vmem:[#allocation2 + $0x184] ss:$16 sps:$4 sm:$0xff]   ;;  %v2505_v49 = vld [vmem:[#allocation2 + $0x180] ss:$16 sps:$4 sm:$0xff]  }
  0x25   :  { %1483 = vmatpush1.bf16.msra.mxu1 %v2470_v23  ;;  %1443 = vmatprep.subr.bf16.mxu0 %v2471_v24  ;;  %v2503_v45 = vld [vmem:[#allocation2 + $0x384] ss:$16 sps:$4 sm:$0xff]   ;;  %v2506_v50 = vld [vmem:[#allocation2 + $0x380] ss:$16 sps:$4 sm:$0xff]  }
  0x26   :  { %1484 = vmatprep.subr.bf16.mxu1 %v2473_v25  ;;  %v36_v46 = vld [vmem:[%s3045_s0] sm:$0xff] }
  0x27   :  { %v2895_v47 = vcombine.high %v36_v46, %v36_v46  ;;  %v2507_v52 = vld [vmem:[#allocation2 + $0x164] ss:$16 sps:$4 sm:$0xff]   ;;  %v2511_v54 = vld [vmem:[#allocation2 + $0x160] ss:$16 sps:$4 sm:$0xff]   ;;  %v2904_v6 = vcombine.low %v36_v46, %v36_v46 }
  0x28   :  { %1444 = vmatpush1.bf16.msra.mxu0 %v2475_v26  ;;  %v2509_v53 = vld [vmem:[#allocation2 + $0x364] ss:$16 sps:$4 sm:$0xff]   ;;  %v2512_v55 = vld [vmem:[#allocation2 + $0x360] ss:$16 sps:$4 sm:$0xff]  }
  0x29   :  { %1485 = vmatpush1.bf16.msra.mxu1 %v2476_v27  ;;  %1445 = vmatprep.subr.bf16.mxu0 %v2477_v28  ;;  %v2513_v56 = vld [vmem:[#allocation2 + $0x144] ss:$16 sps:$4 sm:$0xff]   ;;  %v2517_v58 = vld [vmem:[#allocation2 + $0x140] ss:$16 sps:$4 sm:$0xff]  }
  0x2a   :  { %1486 = vmatprep.subr.bf16.mxu1 %v2479_v29  ;;  %1463 = vmatprep.mubr.bf16.mxu0 %v2895_v47  ;;  %v2515_v57 = vld [vmem:[#allocation2 + $0x344] ss:$16 sps:$4 sm:$0xff]   ;;  %v2518_v59 = vld [vmem:[#allocation2 + $0x340] ss:$16 sps:$4 sm:$0xff]  }
  0x2b   :  { %v2519_v60 = vld [vmem:[#allocation2 + $0x124] ss:$16 sps:$4 sm:$0xff]   ;;  %v2523_v62 = vld [vmem:[#allocation2 + $0x120] ss:$16 sps:$4 sm:$0xff]  }
  0x2c   :  { %1446 = vmatpush1.bf16.msra.mxu0 %v2481_v30  ;;  %v2521_v61 = vld [vmem:[#allocation2 + $0x324] ss:$16 sps:$4 sm:$0xff]   ;;  %v2524_v63 = vld [vmem:[#allocation2 + $0x320] ss:$16 sps:$4 sm:$0xff]  }
  0x2d   :  { %1487 = vmatpush1.bf16.msra.mxu1 %v2482_v31  ;;  %1447 = vmatprep.subr.bf16.mxu0 %v2483_v32  ;;  %v2525_v0 = vld [vmem:[#allocation2 + $0x104] ss:$16 sps:$4 sm:$0xff]   ;;  %v2529_v2 = vld [vmem:[#allocation2 + $0x100] ss:$16 sps:$4 sm:$0xff]  }
  0x2e   :  { %1488 = vmatprep.subr.bf16.mxu1 %v2485_v33  ;;  %v2527_v1 = vld [vmem:[#allocation2 + $0x304] ss:$16 sps:$4 sm:$0xff]   ;;  %v2530_v3 = vld [vmem:[#allocation2 + $0x300] ss:$16 sps:$4 sm:$0xff]  }
  0x2f   :  { %v2537_v4 = vld [vmem:[#allocation2 + $0x4e4] ss:$16 sps:$4 sm:$0xff]   ;;  %v2535_v8 = vld [vmem:[#allocation2 + $0x4e0] ss:$16 sps:$4 sm:$0xff]  }
  0x30   :  { %1448 = vmatpush2.bf16.msra.mxu0 %v2487_v34  ;;  %v2540_v5 = vld [vmem:[#allocation2 + $0x6e4] ss:$16 sps:$4 sm:$0xff]   ;;  %v2538_v9 = vld [vmem:[#allocation2 + $0x6e0] ss:$16 sps:$4 sm:$0xff]  }
  0x31   :  { %1489 = vmatpush2.bf16.msra.mxu1 %v2488_v35  ;;  %1449 = vmatprep.subr.bf16.mxu0 %v2489_v36  ;;  %v2543_v10 = vld [vmem:[#allocation2 + $0x4c4] ss:$16 sps:$4 sm:$0xff]   ;;  %v2541_v12 = vld [vmem:[#allocation2 + $0x4c0] ss:$16 sps:$4 sm:$0xff]  }
  0x32   :  { %1490 = vmatprep.subr.bf16.mxu1 %v2491_v37  ;;  %v2546_v11 = vld [vmem:[#allocation2 + $0x6c4] ss:$16 sps:$4 sm:$0xff]   ;;  %v2544_v13 = vld [vmem:[#allocation2 + $0x6c0] ss:$16 sps:$4 sm:$0xff]  }
  0x33   :  { %v2549_v14 = vld [vmem:[#allocation2 + $0x4a4] ss:$16 sps:$4 sm:$0xff]   ;;  %v2547_v17 = vld [vmem:[#allocation2 + $0x4a0] ss:$16 sps:$4 sm:$0xff]  }
  0x34   :  { %1450 = vmatpush2.bf16.msra.mxu0 %v2493_v38  ;;  %v2552_v15 = vld [vmem:[#allocation2 + $0x6a4] ss:$16 sps:$4 sm:$0xff]   ;;  %v2550_v18 = vld [vmem:[#allocation2 + $0x6a0] ss:$16 sps:$4 sm:$0xff]  }
  0x35   :  { %1491 = vmatpush2.bf16.msra.mxu1 %v2494_v39  ;;  %1451 = vmatprep.subr.bf16.mxu0 %v2495_v40  ;;  %v2555_v19 = vld [vmem:[#allocation2 + $0x484] ss:$16 sps:$4 sm:$0xff]   ;;  %v2553_v21 = vld [vmem:[#allocation2 + $0x480] ss:$16 sps:$4 sm:$0xff]  }
  0x36   :  { %1492 = vmatprep.subr.bf16.mxu1 %v2497_v41  ;;  %v2558_v20 = vld [vmem:[#allocation2 + $0x684] ss:$16 sps:$4 sm:$0xff]   ;;  %v2556_v22 = vld [vmem:[#allocation2 + $0x680] ss:$16 sps:$4 sm:$0xff]  }
  0x37   :  { %v2561_v23 = vld [vmem:[#allocation2 + $0x464] ss:$16 sps:$4 sm:$0xff]   ;;  %v2559_v25 = vld [vmem:[#allocation2 + $0x460] ss:$16 sps:$4 sm:$0xff]  }
  0x38   :  { %1452 = vmatpush2.bf16.msra.mxu0 %v2499_v42  ;;  %v2564_v24 = vld [vmem:[#allocation2 + $0x664] ss:$16 sps:$4 sm:$0xff]   ;;  %v2562_v26 = vld [vmem:[#allocation2 + $0x660] ss:$16 sps:$4 sm:$0xff]   ;;  %v2589_v42 = vld [vmem:[#allocation2 + $0xec] ss:$16 sps:$4 sm:$0xff]  }
  0x39   :  { %1493 = vmatpush2.bf16.msra.mxu1 %v2500_v43  ;;  %1453 = vmatprep.subr.bf16.mxu0 %v2501_v44  ;;  %v2567_v27 = vld [vmem:[#allocation2 + $0x444] ss:$16 sps:$4 sm:$0xff]   ;;  %v2565_v29 = vld [vmem:[#allocation2 + $0x440] ss:$16 sps:$4 sm:$0xff]   ;;  %v2924_v44 = vld [vmem:[%s3045_s0 + $0x18] ss:$0 sps:$4 sm:$0xff]  }
  0x3a   :  { %1494 = vmatprep.subr.bf16.mxu1 %v2503_v45  ;;  %v2570_v28 = vld [vmem:[#allocation2 + $0x644] ss:$16 sps:$4 sm:$0xff]   ;;  %v2568_v30 = vld [vmem:[#allocation2 + $0x640] ss:$16 sps:$4 sm:$0xff]   ;;  %v2587_v45 = vld [vmem:[#allocation2 + $0xe8] ss:$16 sps:$4 sm:$0xff]  }
  0x3b   :  { %v2573_v31 = vld [vmem:[#allocation2 + $0x424] ss:$16 sps:$4 sm:$0xff]   ;;  %v2571_v34 = vld [vmem:[#allocation2 + $0x420] ss:$16 sps:$4 sm:$0xff]  }
  0x3c   :  { %1454 = vmatpush2.bf16.msra.mxu0 %v2505_v49  ;;  %v2576_v32 = vld [vmem:[#allocation2 + $0x624] ss:$16 sps:$4 sm:$0xff]   ;;  %v2574_v36 = vld [vmem:[#allocation2 + $0x620] ss:$16 sps:$4 sm:$0xff]  }
  0x3d   :  { %1495 = vmatpush2.bf16.msra.mxu1 %v2506_v50  ;;  %1455 = vmatprep.subr.bf16.mxu0 %v2507_v52  ;;  %v2914_v33 = vld [vmem:[%s3045_s0 + $0x10] sm:$0xff]  ;;  %v2593_v50 = vld [vmem:[#allocation2 + $0xc8] ss:$16 sps:$4 sm:$0xff]  }
  0x3e   :  { %1496 = vmatprep.subr.bf16.mxu1 %v2509_v53  ;;  %v2918_v35 = vcombine.high %v2914_v33, %v2914_v33  ;;  %v2579_v37 = vld [vmem:[#allocation2 + $0x404] ss:$16 sps:$4 sm:$0xff]   ;;  %v2577_v39 = vld [vmem:[#allocation2 + $0x400] ss:$16 sps:$4 sm:$0xff]   ;;  %v2601_v53 = vld [vmem:[#allocation2 + $0xac] ss:$16 sps:$4 sm:$0xff]  }
  0x3f   :  { %v2582_v38 = vld [vmem:[#allocation2 + $0x604] ss:$16 sps:$4 sm:$0xff]   ;;  %v2580_v40 = vld [vmem:[#allocation2 + $0x600] ss:$16 sps:$4 sm:$0xff]  }
  0x40   :  { %1456 = vmatpush2.bf16.msra.mxu0 %v2511_v54  ;;  %v2585_v41 = vld [vmem:[#allocation2 + $0x5e4] ss:$16 sps:$4 sm:$0xff]   ;;  %v2583_v43 = vld [vmem:[#allocation2 + $0x5e0] ss:$16 sps:$4 sm:$0xff]  }
  0x41   :  { %1497 = vmatpush2.bf16.msra.mxu1 %v2512_v55  ;;  %1457 = vmatprep.subr.bf16.mxu0 %v2513_v56  ;;  %v2592_v46 = vld [vmem:[#allocation2 + $0x5c4] ss:$16 sps:$4 sm:$0xff]   ;;  %v2590_v49 = vld [vmem:[#allocation2 + $0x5c0] ss:$16 sps:$4 sm:$0xff]   ;;  %v2599_v55 = vld [vmem:[#allocation2 + $0xa8] ss:$16 sps:$4 sm:$0xff]  }
  0x42   :  { %1498 = vmatprep.subr.bf16.mxu1 %v2515_v57  ;;  %v2598_v52 = vld [vmem:[#allocation2 + $0x5a4] ss:$16 sps:$4 sm:$0xff]   ;;  %v2596_v54 = vld [vmem:[#allocation2 + $0x5a0] ss:$16 sps:$4 sm:$0xff]   ;;  %v2607_v57 = vld [vmem:[#allocation2 + $0x8c] ss:$16 sps:$4 sm:$0xff]  }
  0x43   :  { %v2604_v56 = vld [vmem:[#allocation2 + $0x584] ss:$16 sps:$4 sm:$0xff]  }
  0x44   :  { %1458 = vmatpush2.bf16.msra.mxu0 %v2517_v58  ;;  %v2602_v58 = vld [vmem:[#allocation2 + $0x580] ss:$16 sps:$4 sm:$0xff]  }
  0x45   :  { %1499 = vmatpush2.bf16.msra.mxu1 %v2518_v59  ;;  %1459 = vmatprep.subr.bf16.mxu0 %v2519_v60  ;;  %v2605_v59 = vld [vmem:[#allocation2 + $0x88] ss:$16 sps:$4 sm:$0xff]   ;;  %v2610_v60 = vld [vmem:[#allocation2 + $0x564] ss:$16 sps:$4 sm:$0xff]  }
  0x46   :  { %1500 = vmatprep.subr.bf16.mxu1 %v2521_v61  ;;  %v2613_v61 = vld [vmem:[#allocation2 + $0x6c] ss:$16 sps:$4 sm:$0xff]  }
  0x48   :  { %1460 = vmatpush2.bf16.msra.mxu0 %v2523_v62  ;;  %v2608_v62 = vld [vmem:[#allocation2 + $0x560] ss:$16 sps:$4 sm:$0xff]  }
  0x49   :  { %1501 = vmatpush2.bf16.msra.mxu1 %v2524_v63  ;;  %1461 = vmatprep.subr.bf16.mxu0 %v2525_v0  ;;  %v2616_v63 = vld [vmem:[#allocation2 + $0x544] ss:$16 sps:$4 sm:$0xff]   ;;  %v2619_v0 = vld [vmem:[#allocation2 + $0x4c] ss:$16 sps:$4 sm:$0xff]  }
  0x4a   :  { %1502 = vmatprep.subr.bf16.mxu1 %v2527_v1  ;;  %v2614_v1 = vld [vmem:[#allocation2 + $0x540] ss:$16 sps:$4 sm:$0xff]  }
  0x4c   :  { %1462 = vmatpush2.bf16.msra.mxu0 %v2529_v2  ;;  %v2617_v2 = vld [vmem:[#allocation2 + $0x48] ss:$16 sps:$4 sm:$0xff]  }
  0x4d   :  { %1503 = vmatpush2.bf16.msra.mxu1 %v2530_v3  ;;  %1513 = vmatprep.subr.bf16.mxu0 %v2537_v4  ;;  %v2622_v3 = vld [vmem:[#allocation2 + $0x524] ss:$16 sps:$4 sm:$0xff]   ;;  %v2625_v4 = vld [vmem:[#allocation2 + $0x2c] ss:$16 sps:$4 sm:$0xff]  }
  0x4e   :  { %1554 = vmatprep.subr.bf16.mxu1 %v2540_v5  ;;  %v2620_v5 = vld [vmem:[#allocation2 + $0x520] ss:$16 sps:$4 sm:$0xff]  }
  0x4f   :  { %1464 = vmatmul.mubr.bf16.vlgmr.msra.gmra.mxu0 %v2904_v6 }
  0x50   :  { %1505 = vmatmul.mubr.bf16.vlgmr.msra.gmra.mxu1 %v2906_v7  ;;  %1514 = vmatpush1.bf16.msra.mxu0 %v2535_v8  ;;  %v2623_v8 = vld [vmem:[#allocation2 + $0x28] ss:$16 sps:$4 sm:$0xff]  }
  0x51   :  { %1555 = vmatpush1.bf16.msra.mxu1 %v2538_v9  ;;  %1515 = vmatprep.subr.bf16.mxu0 %v2543_v10  ;;  %v2628_v9 = vld [vmem:[#allocation2 + $0x504] ss:$16 sps:$4 sm:$0xff]   ;;  %v2631_v10 = vld [vmem:[#allocation2 + $0xc] ss:$16 sps:$4 sm:$0xff]  }
  0x52   :  { %1556 = vmatprep.subr.bf16.mxu1 %v2546_v11  ;;  %1586 = vmatprep.mubr.bf16.mxu1 %v2857_v16  ;;  %v2626_v11 = vld [vmem:[#allocation2 + $0x500] ss:$16 sps:$4 sm:$0xff]  }
  0x53   :  { %1545 = vmatprep.mubr.bf16.mxu0 %v2918_v35 }
  0x54   :  { %1516 = vmatpush1.bf16.msra.mxu0 %v2541_v12  ;;  %v2629_v12 = vld [vmem:[#allocation2 + $0x8] ss:$16 sps:$4 sm:$0xff]  }
  0x55   :  { %1557 = vmatpush1.bf16.msra.mxu1 %v2544_v13  ;;  %1517 = vmatprep.subr.bf16.mxu0 %v2549_v14  ;;  %v2636_v13 = vld [vmem:[#allocation2 + $0x1ec] ss:$16 sps:$4 sm:$0xff]  }
  0x56   :  { %1558 = vmatprep.subr.bf16.mxu1 %v2552_v15  ;;  %v2639_v14 = vld [vmem:[#allocation2 + $0x2ec] ss:$16 sps:$4 sm:$0xff]   ;;  %v2930_v15 = vcombine.low %v2914_v33, %v2914_v33  ;;  %v2658_v33 = vld [vmem:[#allocation2 + $0x168] ss:$16 sps:$4 sm:$0xff]  }
  0x58   :  { %1518 = vmatpush1.bf16.msra.mxu0 %v2547_v17  ;;  %v2634_v17 = vld [vmem:[#allocation2 + $0x1e8] ss:$16 sps:$4 sm:$0xff]  }
  0x59   :  { %1559 = vmatpush1.bf16.msra.mxu1 %v2550_v18  ;;  %1519 = vmatprep.subr.bf16.mxu0 %v2555_v19  ;;  %v2637_v18 = vld [vmem:[#allocation2 + $0x2e8] ss:$16 sps:$4 sm:$0xff]   ;;  %v2642_v19 = vld [vmem:[#allocation2 + $0x1cc] ss:$16 sps:$4 sm:$0xff]  }
  0x5a   :  { %1560 = vmatprep.subr.bf16.mxu1 %v2558_v20  ;;  %v2645_v20 = vld [vmem:[#allocation2 + $0x2cc] ss:$16 sps:$4 sm:$0xff]  }
  0x5c   :  { %1520 = vmatpush1.bf16.msra.mxu0 %v2553_v21  ;;  %v2640_v21 = vld [vmem:[#allocation2 + $0x1c8] ss:$16 sps:$4 sm:$0xff]  }
  0x5d   :  { %1561 = vmatpush1.bf16.msra.mxu1 %v2556_v22  ;;  %1521 = vmatprep.subr.bf16.mxu0 %v2561_v23  ;;  %v2643_v22 = vld [vmem:[#allocation2 + $0x2c8] ss:$16 sps:$4 sm:$0xff]   ;;  %v2648_v23 = vld [vmem:[#allocation2 + $0x1ac] ss:$16 sps:$4 sm:$0xff]  }
  0x5e   :  { %1562 = vmatprep.subr.bf16.mxu1 %v2564_v24  ;;  %v2651_v24 = vld [vmem:[#allocation2 + $0x2ac] ss:$16 sps:$4 sm:$0xff]  }
  0x60   :  { %1522 = vmatpush1.bf16.msra.mxu0 %v2559_v25  ;;  %v2646_v25 = vld [vmem:[#allocation2 + $0x1a8] ss:$16 sps:$4 sm:$0xff]  }
  0x61   :  { %1563 = vmatpush1.bf16.msra.mxu1 %v2562_v26  ;;  %1523 = vmatprep.subr.bf16.mxu0 %v2567_v27  ;;  %v2649_v26 = vld [vmem:[#allocation2 + $0x2a8] ss:$16 sps:$4 sm:$0xff]   ;;  %v2654_v27 = vld [vmem:[#allocation2 + $0x18c] ss:$16 sps:$4 sm:$0xff]  }
  0x62   :  { %1564 = vmatprep.subr.bf16.mxu1 %v2570_v28  ;;  %v2657_v28 = vld [vmem:[#allocation2 + $0x28c] ss:$16 sps:$4 sm:$0xff]  }
  0x64   :  { %1524 = vmatpush1.bf16.msra.mxu0 %v2565_v29  ;;  %v2652_v29 = vld [vmem:[#allocation2 + $0x188] ss:$16 sps:$4 sm:$0xff]  }
  0x65   :  { %1565 = vmatpush1.bf16.msra.mxu1 %v2568_v30  ;;  %1525 = vmatprep.subr.bf16.mxu0 %v2573_v31  ;;  %v2655_v30 = vld [vmem:[#allocation2 + $0x288] ss:$16 sps:$4 sm:$0xff]   ;;  %v2660_v31 = vld [vmem:[#allocation2 + $0x16c] ss:$16 sps:$4 sm:$0xff]  }
  0x66   :  { %1566 = vmatprep.subr.bf16.mxu1 %v2576_v32  ;;  %v2663_v32 = vld [vmem:[#allocation2 + $0x26c] ss:$16 sps:$4 sm:$0xff]  }
  0x68   :  { %1526 = vmatpush1.bf16.msra.mxu0 %v2571_v34  ;;  %v2666_v34 = vld [vmem:[#allocation2 + $0x14c] ss:$16 sps:$4 sm:$0xff]  }
  0x69   :  { %1567 = vmatpush1.bf16.msra.mxu1 %v2574_v36  ;;  %1527 = vmatprep.subr.bf16.mxu0 %v2579_v37  ;;  %v2669_v36 = vld [vmem:[#allocation2 + $0x24c] ss:$16 sps:$4 sm:$0xff]   ;;  %v2664_v37 = vld [vmem:[#allocation2 + $0x148] ss:$16 sps:$4 sm:$0xff]  }
  0x6a   :  { %1568 = vmatprep.subr.bf16.mxu1 %v2582_v38  ;;  %v2667_v38 = vld [vmem:[#allocation2 + $0x248] ss:$16 sps:$4 sm:$0xff]  }
  0x6c   :  { %1528 = vmatpush1.bf16.msra.mxu0 %v2577_v39  ;;  %v2672_v39 = vld [vmem:[#allocation2 + $0x12c] ss:$16 sps:$4 sm:$0xff]  }
  0x6d   :  { %1569 = vmatpush1.bf16.msra.mxu1 %v2580_v40  ;;  %1529 = vmatprep.subr.bf16.mxu0 %v2585_v41  ;;  %v2675_v40 = vld [vmem:[#allocation2 + $0x22c] ss:$16 sps:$4 sm:$0xff]   ;;  %v2670_v41 = vld [vmem:[#allocation2 + $0x128] ss:$16 sps:$4 sm:$0xff]  }
  0x6e   :  { %1595 = vmatprep.subr.bf16.mxu1 %v2589_v42  ;;  %v2673_v42 = vld [vmem:[#allocation2 + $0x228] ss:$16 sps:$4 sm:$0xff]  }
  0x70   :  { %1587 = vmatmul.mubr.bf16.vlgmr.msra.gmra.mxu1 %v2924_v44  ;;  %1530 = vmatpush2.bf16.msra.mxu0 %v2583_v43  ;;  %v2678_v43 = vld [vmem:[#allocation2 + $0x10c] ss:$16 sps:$4 sm:$0xff]  }
  0x71   :  { %1596 = vmatpush1.bf16.msra.mxu1 %v2587_v45  ;;  %1531 = vmatprep.subr.bf16.mxu0 %v2592_v46  ;;  %v2681_v45 = vld [vmem:[#allocation2 + $0x20c] ss:$16 sps:$4 sm:$0xff]   ;;  %v2676_v46 = vld [vmem:[#allocation2 + $0x108] ss:$16 sps:$4 sm:$0xff]  }
  0x72   :  { %1597 = vmatprep.subr.bf16.mxu1 %v2595_v48  ;;  %1627 = vmatprep.mubr.bf16.mxu1 %v2895_v47  ;;  %v2611_v47 = vld [vmem:[#allocation2 + $0x68] ss:$16 sps:$4 sm:$0xff]  }
  0x73   :  { %v2679_v48 = vld [vmem:[#allocation2 + $0x208] ss:$16 sps:$4 sm:$0xff]  }
  0x74   :  { %1532 = vmatpush2.bf16.msra.mxu0 %v2590_v49  ;;  %v2684_v49 = vld [vmem:[#allocation2 + $0x3ec] ss:$16 sps:$4 sm:$0xff]  }
  0x75   :  { %1598 = vmatpush1.bf16.msra.mxu1 %v2593_v50  ;;  %1533 = vmatprep.subr.bf16.mxu0 %v2598_v52  ;;  %v2687_v50 = vld [vmem:[#allocation2 + $0x4ec] ss:$16 sps:$4 sm:$0xff]   ;;  %v2682_v52 = vld [vmem:[#allocation2 + $0x3e8] ss:$16 sps:$4 sm:$0xff]  }
  0x76   :  { %1599 = vmatprep.subr.bf16.mxu1 %v2601_v53  ;;  %v2685_v53 = vld [vmem:[#allocation2 + $0x4e8] ss:$16 sps:$4 sm:$0xff]  }
  0x78   :  { %1534 = vmatpush2.bf16.msra.mxu0 %v2596_v54  ;;  %v2690_v54 = vld [vmem:[#allocation2 + $0x3cc] ss:$16 sps:$4 sm:$0xff]  }
  0x79   :  { %1600 = vmatpush1.bf16.msra.mxu1 %v2599_v55  ;;  %1535 = vmatprep.subr.bf16.mxu0 %v2604_v56  ;;  %v2693_v55 = vld [vmem:[#allocation2 + $0x4cc] ss:$16 sps:$4 sm:$0xff]   ;;  %v2688_v56 = vld [vmem:[#allocation2 + $0x3c8] ss:$16 sps:$4 sm:$0xff]  }
  0x7a   :  { %1601 = vmatprep.subr.bf16.mxu1 %v2607_v57  ;;  %v2691_v57 = vld [vmem:[#allocation2 + $0x4c8] ss:$16 sps:$4 sm:$0xff]  }
  0x7c   :  { %1536 = vmatpush2.bf16.msra.mxu0 %v2602_v58  ;;  %v2696_v58 = vld [vmem:[#allocation2 + $0x3ac] ss:$16 sps:$4 sm:$0xff]  }
  0x7d   :  { %1602 = vmatpush1.bf16.msra.mxu1 %v2605_v59  ;;  %1537 = vmatprep.subr.bf16.mxu0 %v2610_v60  ;;  %v2699_v59 = vld [vmem:[#allocation2 + $0x4ac] ss:$16 sps:$4 sm:$0xff]   ;;  %v2694_v60 = vld [vmem:[#allocation2 + $0x3a8] ss:$16 sps:$4 sm:$0xff]  }
  0x7e   :  { %1603 = vmatprep.subr.bf16.mxu1 %v2613_v61  ;;  %v2697_v61 = vld [vmem:[#allocation2 + $0x4a8] ss:$16 sps:$4 sm:$0xff]  }
  0x80   :  { %1538 = vmatpush2.bf16.msra.mxu0 %v2608_v62  ;;  %v2702_v62 = vld [vmem:[#allocation2 + $0x38c] ss:$16 sps:$4 sm:$0xff]  }
  0x81   :  { %1604 = vmatpush1.bf16.msra.mxu1 %v2611_v47  ;;  %1539 = vmatprep.subr.bf16.mxu0 %v2616_v63  ;;  %v2705_v47 = vld [vmem:[#allocation2 + $0x48c] ss:$16 sps:$4 sm:$0xff]   ;;  %v2700_v63 = vld [vmem:[#allocation2 + $0x388] ss:$16 sps:$4 sm:$0xff]  }
  0x82   :  { %1605 = vmatprep.subr.bf16.mxu1 %v2619_v0  ;;  %v2708_v0 = vld [vmem:[#allocation2 + $0x36c] ss:$16 sps:$4 sm:$0xff]  }
  0x84   :  { %1540 = vmatpush2.bf16.msra.mxu0 %v2614_v1  ;;  %v2711_v1 = vld [vmem:[#allocation2 + $0x46c] ss:$16 sps:$4 sm:$0xff]  }
  0x85   :  { %1606 = vmatpush1.bf16.msra.mxu1 %v2617_v2  ;;  %1541 = vmatprep.subr.bf16.mxu0 %v2622_v3  ;;  %v2706_v2 = vld [vmem:[#allocation2 + $0x368] ss:$16 sps:$4 sm:$0xff]  }
  0x86   :  { %1607 = vmatprep.subr.bf16.mxu1 %v2625_v4  ;;  %v2709_v3 = vld [vmem:[#allocation2 + $0x468] ss:$16 sps:$4 sm:$0xff]   ;;  %v2717_v4 = vld [vmem:[#allocation2 + $0x44c] ss:$16 sps:$4 sm:$0xff]  }
  0x88   :  { %1542 = vmatpush2.bf16.msra.mxu0 %v2620_v5  ;;  %v2712_v5 = vld [vmem:[#allocation2 + $0x348] ss:$16 sps:$4 sm:$0xff]  }
  0x89   :  { %1608 = vmatpush1.bf16.msra.mxu1 %v2623_v8  ;;  %1543 = vmatprep.subr.bf16.mxu0 %v2628_v9  ;;  %v2715_v8 = vld [vmem:[#allocation2 + $0x448] ss:$16 sps:$4 sm:$0xff]   ;;  %v2720_v9 = vld [vmem:[#allocation2 + $0x32c] ss:$16 sps:$4 sm:$0xff]  }
  0x8a   :  { %1609 = vmatprep.subr.bf16.mxu1 %v2631_v10  ;;  %v2723_v10 = vld [vmem:[#allocation2 + $0x42c] ss:$16 sps:$4 sm:$0xff]  }
  0x8c   :  { %1544 = vmatpush2.bf16.msra.mxu0 %v2626_v11  ;;  %v2718_v11 = vld [vmem:[#allocation2 + $0x328] ss:$16 sps:$4 sm:$0xff]  }
  0x8d   :  { %1610 = vmatpush1.bf16.msra.mxu1 %v2629_v12  ;;  %1636 = vmatprep.subr.bf16.mxu0 %v2639_v14  ;;  %v2721_v12 = vld [vmem:[#allocation2 + $0x428] ss:$16 sps:$4 sm:$0xff]   ;;  %v2729_v14 = vld [vmem:[#allocation2 + $0x40c] ss:$16 sps:$4 sm:$0xff]  }
  0x8e   :  { %1611 = vmatprep.subr.bf16.mxu1 %v2636_v13  ;;  %v2726_v13 = vld [vmem:[#allocation2 + $0x30c] ss:$16 sps:$4 sm:$0xff]  }
  0x8f   :  { %1546 = vmatmul.mubr.bf16.vlgmr.msra.gmra.mxu0 %v2930_v15 }
  0x90   :  { %1637 = vmatpush1.bf16.msra.mxu0 %v2637_v18  ;;  %1668 = vmatprep.mubr.bf16.mxu0 %v2900_v51  ;;  %v2661_v51 = vld [vmem:[#allocation2 + $0x268] ss:$16 sps:$4 sm:$0xff]  }
  0x91   :  { %1612 = vmatpush2.bf16.msra.mxu1 %v2634_v17  ;;  %1638 = vmatprep.subr.bf16.mxu0 %v2645_v20  ;;  %v2724_v17 = vld [vmem:[#allocation2 + $0x308] ss:$16 sps:$4 sm:$0xff]   ;;  %v2735_v20 = vld [vmem:[#allocation2 + $0x6ec] ss:$16 sps:$4 sm:$0xff]  }
  0x92   :  { %1613 = vmatprep.subr.bf16.mxu1 %v2642_v19  ;;  %v2727_v18 = vld [vmem:[#allocation2 + $0x408] ss:$16 sps:$4 sm:$0xff]   ;;  %v2732_v19 = vld [vmem:[#allocation2 + $0x5ec] ss:$16 sps:$4 sm:$0xff]  }
  0x94   :  { %1639 = vmatpush1.bf16.msra.mxu0 %v2643_v22  ;;  %v2733_v22 = vld [vmem:[#allocation2 + $0x6e8] ss:$16 sps:$4 sm:$0xff]  }
  0x95   :  { %1614 = vmatpush2.bf16.msra.mxu1 %v2640_v21  ;;  %1640 = vmatprep.subr.bf16.mxu0 %v2651_v24  ;;  %v2730_v21 = vld [vmem:[#allocation2 + $0x5e8] ss:$16 sps:$4 sm:$0xff]   ;;  %v2741_v24 = vld [vmem:[#allocation2 + $0x6cc] ss:$16 sps:$4 sm:$0xff]  }
  0x96   :  { %1615 = vmatprep.subr.bf16.mxu1 %v2648_v23  ;;  %v2738_v23 = vld [vmem:[#allocation2 + $0x5cc] ss:$16 sps:$4 sm:$0xff]  }
  0x98   :  { %1641 = vmatpush1.bf16.msra.mxu0 %v2649_v26  ;;  %v2739_v26 = vld [vmem:[#allocation2 + $0x6c8] ss:$16 sps:$4 sm:$0xff]  }
  0x99   :  { %1616 = vmatpush2.bf16.msra.mxu1 %v2646_v25  ;;  %1642 = vmatprep.subr.bf16.mxu0 %v2657_v28  ;;  %v2736_v25 = vld [vmem:[#allocation2 + $0x5c8] ss:$16 sps:$4 sm:$0xff]   ;;  %v2747_v28 = vld [vmem:[#allocation2 + $0x6ac] ss:$16 sps:$4 sm:$0xff]  }
  0x9a   :  { %1617 = vmatprep.subr.bf16.mxu1 %v2654_v27  ;;  %v2744_v27 = vld [vmem:[#allocation2 + $0x5ac] ss:$16 sps:$4 sm:$0xff]  }
  0x9c   :  { %1643 = vmatpush1.bf16.msra.mxu0 %v2655_v30  ;;  %v2745_v30 = vld [vmem:[#allocation2 + $0x6a8] ss:$16 sps:$4 sm:$0xff]  }
  0x9d   :  { %1618 = vmatpush2.bf16.msra.mxu1 %v2652_v29  ;;  %1644 = vmatprep.subr.bf16.mxu0 %v2663_v32  ;;  %v2742_v29 = vld [vmem:[#allocation2 + $0x5a8] ss:$16 sps:$4 sm:$0xff]   ;;  %v2753_v32 = vld [vmem:[#allocation2 + $0x68c] ss:$16 sps:$4 sm:$0xff]  }
  0x9e   :  { %1619 = vmatprep.subr.bf16.mxu1 %v2660_v31  ;;  %v2750_v31 = vld [vmem:[#allocation2 + $0x58c] ss:$16 sps:$4 sm:$0xff]  }
  0xa0   :  { %1645 = vmatpush1.bf16.msra.mxu0 %v2661_v51  ;;  %v2756_v51 = vld [vmem:[#allocation2 + $0x56c] ss:$16 sps:$4 sm:$0xff]  }
  0xa1   :  { %1620 = vmatpush2.bf16.msra.mxu1 %v2658_v33  ;;  %1646 = vmatprep.subr.bf16.mxu0 %v2669_v36  ;;  %v2751_v33 = vld [vmem:[#allocation2 + $0x688] ss:$16 sps:$4 sm:$0xff]  }
  0xa2   :  { %1621 = vmatprep.subr.bf16.mxu1 %v2666_v34  ;;  %v2759_v34 = vld [vmem:[#allocation2 + $0x66c] ss:$16 sps:$4 sm:$0xff]   ;;  %v2754_v36 = vld [vmem:[#allocation2 + $0x568] ss:$16 sps:$4 sm:$0xff]  }
  0xa4   :  { %1647 = vmatpush1.bf16.msra.mxu0 %v2667_v38  ;;  %v2765_v38 = vld [vmem:[#allocation2 + $0x64c] ss:$16 sps:$4 sm:$0xff]  }
  0xa5   :  { %1622 = vmatpush2.bf16.msra.mxu1 %v2664_v37  ;;  %1648 = vmatprep.subr.bf16.mxu0 %v2675_v40  ;;  %v2762_v37 = vld [vmem:[#allocation2 + $0x54c] ss:$16 sps:$4 sm:$0xff]   ;;  %v2763_v40 = vld [vmem:[#allocation2 + $0x648] ss:$16 sps:$4 sm:$0xff]  }
  0xa6   :  { %1623 = vmatprep.subr.bf16.mxu1 %v2672_v39  ;;  %v2760_v39 = vld [vmem:[#allocation2 + $0x548] ss:$16 sps:$4 sm:$0xff]  }
  0xa8   :  { %1649 = vmatpush1.bf16.msra.mxu0 %v2673_v42  ;;  %v2771_v42 = vld [vmem:[#allocation2 + $0x62c] ss:$16 sps:$4 sm:$0xff]  }
  0xa9   :  { %1624 = vmatpush2.bf16.msra.mxu1 %v2670_v41  ;;  %1650 = vmatprep.subr.bf16.mxu0 %v2681_v45  ;;  %v2768_v41 = vld [vmem:[#allocation2 + $0x52c] ss:$16 sps:$4 sm:$0xff]   ;;  %v2769_v45 = vld [vmem:[#allocation2 + $0x628] ss:$16 sps:$4 sm:$0xff]  }
  0xaa   :  { %1625 = vmatprep.subr.bf16.mxu1 %v2678_v43  ;;  %v2766_v43 = vld [vmem:[#allocation2 + $0x528] ss:$16 sps:$4 sm:$0xff]  }
  0xac   :  { %1651 = vmatpush1.bf16.msra.mxu0 %v2679_v48  ;;  %v2777_v48 = vld [vmem:[#allocation2 + $0x60c] ss:$16 sps:$4 sm:$0xff]  }
  0xad   :  { %1626 = vmatpush2.bf16.msra.mxu1 %v2676_v46  ;;  %1652 = vmatprep.subr.bf16.mxu0 %v2684_v49  ;;  %v2774_v46 = vld [vmem:[#allocation2 + $0x50c] ss:$16 sps:$4 sm:$0xff]   ;;  %v2772_v49 = vld [vmem:[#allocation2 + $0x508] ss:$16 sps:$4 sm:$0xff]  }
  0xae   :  { %1677 = vmatprep.subr.bf16.mxu1 %v2687_v50  ;;  %v2775_v50 = vld [vmem:[#allocation2 + $0x608] ss:$16 sps:$4 sm:$0xff]  }
  0xb0   :  { %1628 = vmatmul.mubr.bf16.vlgmr.msra.gmra.mxu1 %v2904_v6  ;;  %1653 = vmatpush2.bf16.msra.mxu0 %v2682_v52  ;;  %v2703_v6 = vld [vmem:[#allocation2 + $0x488] ss:$16 sps:$4 sm:$0xff]  }
  0xb1   :  { %1678 = vmatpush1.bf16.msra.mxu1 %v2685_v53  ;;  %1654 = vmatprep.subr.bf16.mxu0 %v2690_v54  ;;  %v2778_v52 = vld [vmem:[%s3048_s3 + $0x78] sm:$0xff]   ;;  %v2780_v54 = vld [vmem:[%s3048_s3 + $0x70] sm:$0xff]  }
  0xb2   :  { %1679 = vmatprep.subr.bf16.mxu1 %v2693_v55  ;;  %1709 = vmatprep.mubr.bf16.mxu1 %v2918_v35  ;;  %v2714_v35 = vld [vmem:[#allocation2 + $0x34c] ss:$16 sps:$4 sm:$0xff]   ;;  %v2781_v55 = vld [vmem:[%s3048_s3 + $0x30] sm:$0xff]  }
  0xb3   :  { %v2779_v53 = vld [vmem:[%s3048_s3 + $0x38] sm:$0xff]  }
  0xb4   :  { %1655 = vmatpush2.bf16.msra.mxu0 %v2688_v56  ;;  %v2782_v56 = vld [vmem:[%s3048_s3 + $0x68] sm:$0xff]  }
  0xb5   :  { %1680 = vmatpush1.bf16.msra.mxu1 %v2691_v57  ;;  %1656 = vmatprep.subr.bf16.mxu0 %v2696_v58  ;;  %v2783_v57 = vld [vmem:[%s3048_s3 + $0x28] sm:$0xff]   ;;  %v2786_v58 = vld [vmem:[%s3048_s3 + $0x58] sm:$0xff]  }
  0xb6   :  { %1681 = vmatprep.subr.bf16.mxu1 %v2699_v59  ;;  %v2787_v59 = vld [vmem:[%s3048_s3 + $0x18] sm:$0xff]  }
  0xb8   :  { %1657 = vmatpush2.bf16.msra.mxu0 %v2694_v60  ;;  %v2788_v60 = vld [vmem:[%s3048_s3 + $0x50] sm:$0xff]  }
  0xb9   :  { %1682 = vmatpush1.bf16.msra.mxu1 %v2697_v61  ;;  %1658 = vmatprep.subr.bf16.mxu0 %v2702_v62  ;;  %v2789_v61 = vld [vmem:[%s3048_s3 + $0x10] sm:$0xff]   ;;  %v2790_v62 = vld [vmem:[%s3048_s3 + $0x48] sm:$0xff]  }
  0xba   :  { %1683 = vmatprep.subr.bf16.mxu1 %v2705_v47  ;;  %v2791_v47 = vld [vmem:[%s3048_s3 + $0x8] sm:$0xff]  }
  0xbc   :  { %1659 = vmatpush2.bf16.msra.mxu0 %v2700_v63  ;;  %v2792_v63 = vld [vmem:[%s3048_s3 + $0x40] sm:$0xff]  }
  0xbd   :  { %1684 = vmatpush1.bf16.msra.mxu1 %v2703_v6  ;;  %1660 = vmatprep.subr.bf16.mxu0 %v2708_v0  ;;  %v2793_v6 = vld [vmem:[%s3048_s3] sm:$0xff]  }
  0xbe   :  { %1685 = vmatprep.subr.bf16.mxu1 %v2711_v1 }
  0xc0   :  { %1661 = vmatpush2.bf16.msra.mxu0 %v2706_v2 }
  0xc1   :  { %1686 = vmatpush1.bf16.msra.mxu1 %v2709_v3  ;;  %1662 = vmatprep.subr.bf16.mxu0 %v2714_v35 }
  0xc2   :  { %1687 = vmatprep.subr.bf16.mxu1 %v2717_v4 }
  0xc4   :  { %1663 = vmatpush2.bf16.msra.mxu0 %v2712_v5 }
  0xc5   :  { %1688 = vmatpush1.bf16.msra.mxu1 %v2715_v8  ;;  %1664 = vmatprep.subr.bf16.mxu0 %v2720_v9  ;;  %v2794_v9 = vld [vmem:[%s3048_s3 + $0xf8] sm:$0xff]  }
  0xc6   :  { %1689 = vmatprep.subr.bf16.mxu1 %v2723_v10  ;;  %v2795_v10 = vld [vmem:[%s3048_s3 + $0xb8] sm:$0xff]  }
  0xc8   :  { %1665 = vmatpush2.bf16.msra.mxu0 %v2718_v11  ;;  %v2796_v11 = vld [vmem:[%s3048_s3 + $0xf0] sm:$0xff]  }
  0xc9   :  { %1690 = vmatpush1.bf16.msra.mxu1 %v2721_v12  ;;  %1666 = vmatprep.subr.bf16.mxu0 %v2726_v13  ;;  %v2797_v12 = vld [vmem:[%s3048_s3 + $0xb0] sm:$0xff]   ;;  %v2798_v13 = vld [vmem:[%s3048_s3 + $0xe8] sm:$0xff]  }
  0xca   :  { %1691 = vmatprep.subr.bf16.mxu1 %v2729_v14  ;;  %v2799_v14 = vld [vmem:[%s3048_s3 + $0xa8] sm:$0xff]  }
  0xcc   :  { %1667 = vmatpush2.bf16.msra.mxu0 %v2724_v17  ;;  %v2800_v17 = vld [vmem:[%s3048_s3 + $0xe0] sm:$0xff]  }
  0xcd   :  { %1692 = vmatpush1.bf16.msra.mxu1 %v2727_v18  ;;  %1718 = vmatprep.subr.bf16.mxu0 %v2735_v20  ;;  %v2801_v18 = vld [vmem:[%s3048_s3 + $0xa0] sm:$0xff]   ;;  %v2803_v20 = vld [vmem:[%s3048_s3 + $0x98] sm:$0xff]  }
  0xce   :  { %1693 = vmatprep.subr.bf16.mxu1 %v2732_v19  ;;  %v2802_v19 = vld [vmem:[%s3048_s3 + $0xd8] sm:$0xff]  }
  0xcf   :  { %1669 = vmatmul.mubr.bf16.vlgmr.msra.gmra.mxu0 %v2906_v7  ;;  %v2748_v7 = vld [vmem:[#allocation2 + $0x588] ss:$16 sps:$4 sm:$0xff]  }
  0xd0   :  { %1719 = vmatpush1.bf16.msra.mxu0 %v2733_v22  ;;  %1750 = vmatprep.mubr.bf16.mxu0 %v2857_v16  ;;  %v2757_v16 = vld [vmem:[#allocation2 + $0x668] ss:$16 sps:$4 sm:$0xff]   ;;  %v2805_v22 = vld [vmem:[%s3048_s3 + $0x90] sm:$0xff]  }
  0xd1   :  { %1694 = vmatpush2.bf16.msra.mxu1 %v2730_v21  ;;  %1720 = vmatprep.subr.bf16.mxu0 %v2741_v24  ;;  %v2804_v21 = vld [vmem:[%s3048_s3 + $0xd0] sm:$0xff]   ;;  %v2806_v24 = vld [vmem:[%s3048_s3 + $0xc8] sm:$0xff]  }
  0xd2   :  { %1695 = vmatprep.subr.bf16.mxu1 %v2738_v23 }
  0xd4   :  { %1721 = vmatpush1.bf16.msra.mxu0 %v2739_v26 }
  0xd5   :  { %1696 = vmatpush2.bf16.msra.mxu1 %v2736_v25  ;;  %1722 = vmatprep.subr.bf16.mxu0 %v2747_v28  ;;  %v2807_v25 = vld [vmem:[%s3048_s3 + $0x88] sm:$0xff]   ;;  %v2808_v28 = vld [vmem:[%s3048_s3 + $0xc0] sm:$0xff]  }
  0xd6   :  { %1697 = vmatprep.subr.bf16.mxu1 %v2744_v27 }
  0xd8   :  { %1723 = vmatpush1.bf16.msra.mxu0 %v2745_v30 }
  0xd9   :  { %1698 = vmatpush2.bf16.msra.mxu1 %v2742_v29  ;;  %1724 = vmatprep.subr.bf16.mxu0 %v2753_v32  ;;  %v2809_v29 = vld [vmem:[%s3048_s3 + $0x80] sm:$0xff]  }
  0xda   :  { %1699 = vmatprep.subr.bf16.mxu1 %v2750_v31  ;;  %v266_v31 = vlaneseq }
  0xdc   :  { %1725 = vmatpush1.bf16.msra.mxu0 %v2751_v33  ;;  %v267_v32 = vshrl.u32 %v266_v31, 7  ;;  %v264_v33 = vld [vmem:[%s3047_s2] sm:$0xf] }
  0xdd   :  { %1700 = vmatpush2.bf16.msra.mxu1 %v2748_v7  ;;  %1726 = vmatprep.subr.bf16.mxu0 %v2759_v34 }
  0xde   :  { %1701 = vmatprep.subr.bf16.mxu1 %v2756_v51  ;;  %v268_v7 = vsub.s32 0, %v267_v32  ;;  %v272_v51 = vsub.s32 1, %v267_v32 }
  0xe0   :  { %1727 = vmatpush1.bf16.msra.mxu0 %v2757_v16  ;;  %v269_v34 = vrot.slane %v264_v33, %v268_v7 }
  0xe1   :  { %1702 = vmatpush2.bf16.msra.mxu1 %v2754_v36  ;;  %1728 = vmatprep.subr.bf16.mxu0 %v2765_v38  ;;  %v273_v36 = vrot.slane %v264_v33, %v272_v51 }
  0xe2   :  { %1703 = vmatprep.subr.bf16.mxu1 %v2762_v37 }
  0xe4   :  { %1729 = vmatpush1.bf16.msra.mxu0 %v2763_v40 }
  0xe5   :  { %1704 = vmatpush2.bf16.msra.mxu1 %v2760_v39  ;;  %1730 = vmatprep.subr.bf16.mxu0 %v2771_v42 }
  0xe6   :  { %1705 = vmatprep.subr.bf16.mxu1 %v2768_v41 }
  0xe8   :  { %1731 = vmatpush1.bf16.msra.mxu0 %v2769_v45 }
  0xe9   :  { %1706 = vmatpush2.bf16.msra.mxu1 %v2766_v43  ;;  %1732 = vmatprep.subr.bf16.mxu0 %v2777_v48 }
  0xea   :  { %1707 = vmatprep.subr.bf16.mxu1 %v2774_v46 }
  0xec   :  { %1733 = vmatpush1.bf16.msra.mxu0 %v2775_v50 }
  0xed   :  { %1708 = vmatpush2.bf16.msra.mxu1 %v2772_v49  ;;  %2386 = vmatprep.subr.bf16.mxu0 %v2778_v52 }
  0xee   :  { %2408 = vmatprep.subr.bf16.mxu1 %v2794_v9 }
  0xef   :  { %1751 = vmatmul.mubr.bf16.vlgmr.msra.gmra.mxu0 %v2924_v44  ;;  %v2784_v44 = vld [vmem:[%s3048_s3 + $0x60] sm:$0xff]  }
  0xf0   :  { %1710 = vmatmul.mubr.bf16.vlgmr.msra.gmra.mxu1 %v2930_v15  ;;  %2387 = vmatpush3.bf16.msra.mxu0 %v2779_v53  ;;  %v2785_v15 = vld [vmem:[%s3048_s3 + $0x20] sm:$0xff]  }
  0xf1   :  { %2388 = vmatprep.subr.bf16.mxu0 %v2780_v54  ;;  %2409 = vmatpush3.bf16.msra.mxu1 %v2795_v10 }
  0xf2   :  { %2410 = vmatprep.subr.bf16.mxu1 %v2796_v11 }
  0xf4   :  { %2389 = vmatpush3.bf16.msra.mxu0 %v2781_v55 }
  0xf5   :  { %2390 = vmatprep.subr.bf16.mxu0 %v2782_v56  ;;  %2411 = vmatpush3.bf16.msra.mxu1 %v2797_v12 }
  0xf6   :  { %2412 = vmatprep.subr.bf16.mxu1 %v2798_v13 }
  0xf8   :  { %2391 = vmatpush3.bf16.msra.mxu0 %v2783_v57 }
  0xf9   :  { %2392 = vmatprep.subr.bf16.mxu0 %v2784_v44  ;;  %2413 = vmatpush3.bf16.msra.mxu1 %v2799_v14 }
  0xfa   :  { %2414 = vmatprep.subr.bf16.mxu1 %v2800_v17 }
  0xfc   :  { %2393 = vmatpush3.bf16.msra.mxu0 %v2785_v15 }
  0xfd   :  { %2394 = vmatprep.subr.bf16.mxu0 %v2786_v58  ;;  %2415 = vmatpush3.bf16.msra.mxu1 %v2801_v18 }
  0xfe   :  { %2416 = vmatprep.subr.bf16.mxu1 %v2802_v19 }
 0x100   :  { %2395 = vmatpush3.bf16.msra.mxu0 %v2787_v59  ;;  %v276_v59 = vsub.s32 2, %v267_v32 }
 0x101   :  { %2396 = vmatprep.subr.bf16.mxu0 %v2788_v60  ;;  %2417 = vmatpush3.bf16.msra.mxu1 %v2803_v20  ;;  %v280_v60 = vsub.s32 3, %v267_v32 }
 0x102   :  { %2418 = vmatprep.subr.bf16.mxu1 %v2804_v21 }
 0x104   :  { %2397 = vmatpush3.bf16.msra.mxu0 %v2789_v61  ;;  %v277_v61 = vrot.slane %v264_v33, %v276_v59 }
 0x105   :  { %2398 = vmatprep.subr.bf16.mxu0 %v2790_v62  ;;  %2419 = vmatpush3.bf16.msra.mxu1 %v2805_v22  ;;  %v281_v62 = vrot.slane %v264_v33, %v280_v60 }
 0x106   :  { %2420 = vmatprep.subr.bf16.mxu1 %v2806_v24 }
 0x108   :  { %2399 = vmatpush3.bf16.msra.mxu0 %v2791_v47 }
 0x109   :  { %2400 = vmatprep.subr.bf16.mxu0 %v2792_v63  ;;  %2421 = vmatpush3.bf16.msra.mxu1 %v2807_v25 }
 0x10a   :  { %2422 = vmatprep.subr.bf16.mxu1 %v2808_v28 }
 0x10c   :  { %2401 = vmatpush3.bf16.msra.mxu0 %v2793_v6 }
 0x10d   :  { %2423 = vmatpush3.bf16.msra.mxu1 %v2809_v29 }
 0x10f   :  { %v1465_v0 = vpop.f32.mrf.mxu0 }
 0x110   :  { %v1506_v1 = vpop.f32.mrf.mxu1  ;;  %v1466_v16 = vadd.f32 %v1465_v0, %v269_v34 }
 0x111   :  { %v1467_v2 = vpop.f32.mrf.mxu0 }
 0x112   :  { %v1508_v3 = vpop.f32.mrf.mxu1  ;;  %v1468_v37 = vadd.f32 %v1467_v2, %v273_v36  ;;  %v1507_v38 = vadd.f32 %v1506_v1, %v1466_v16 }
 0x113   :  { %v1469_v35 = vpop.f32.mrf.mxu0 }
 0x114   :  { %v1510_v4 = vpop.f32.mrf.mxu1  ;;  %v1509_v40 = vadd.f32 %v1508_v3, %v1468_v37 }
 0x115   :  { %v1470_v5 = vpop.f32.mrf.mxu0 }
 0x116   :  { %v1511_v8 = vpop.f32.mrf.mxu1 }
 0x130   :  { %v1588_v23 = vpop.f32.mrf.mxu1 }
 0x132   :  { %v1590_v26 = vpop.f32.mrf.mxu1 }
 0x134   :  { %v1592_v27 = vpop.f32.mrf.mxu1 }
 0x136   :  { %v1593_v30 = vpop.f32.mrf.mxu1 }
 0x14f   :  { %v1547_v39 = vpop.f32.mrf.mxu0 }
 0x150   :  { %v1548_v41 = vadd.f32 %v1547_v39, %v1507_v38 }
 0x151   :  { %v1549_v42 = vpop.f32.mrf.mxu0 }
 0x152   :  { %v1550_v43 = vadd.f32 %v1549_v42, %v1509_v40  ;;  %v1589_v45 = vadd.f32 %v1588_v23, %v1548_v41  ;;  %v2353_v23 = vld [vmem:[%s3049_s4] ss:$0 sm:$0xff] }
 0x153   :  { %v1551_v46 = vpop.f32.mrf.mxu0 }
 0x154   :  { %v1591_v48 = vadd.f32 %v1590_v26, %v1550_v43  ;;  %v1759_v52 = vpack.c.bf16 %v1589_v45, %v1589_v45 }
 0x155   :  { %v1552_v49 = vpop.f32.mrf.mxu0 }
 0x156   :  { %v1760_v50 = vpack.c.bf16 %v1591_v48, %v1591_v48 }
 0x158   :  { %2058 = vmatprep.mubr.bf16.mxu0 %v1760_v50 }
 0x159   :  { %2059 = vmatmul.mubr.bf16.vlgmr.msra.gmra.mxu0 %v1759_v52 }
 0x170   :  { %v1629_v53 = vpop.f32.mrf.mxu1 }
 0x171   :  { %v1630_v47 = vadd.f32 %v1629_v53, %v277_v61 }
 0x172   :  { %v1631_v54 = vpop.f32.mrf.mxu1 }
 0x173   :  { %v1632_v63 = vadd.f32 %v1631_v54, %v281_v62 }
 0x174   :  { %v1633_v55 = vpop.f32.mrf.mxu1 }
 0x176   :  { %v1634_v56 = vpop.f32.mrf.mxu1 }
 0x18f   :  { %v1670_v57 = vpop.f32.mrf.mxu0 }
 0x190   :  { %v1671_v6 = vadd.f32 %v1670_v57, %v1630_v47 }
 0x191   :  { %v1672_v44 = vpop.f32.mrf.mxu0 }
 0x192   :  { %v1673_v2 = vadd.f32 %v1672_v44, %v1632_v63 }
 0x193   :  { %v1674_v15 = vpop.f32.mrf.mxu0 }
 0x195   :  { %v1675_v58 = vpop.f32.mrf.mxu0 }
 0x1af   :  { %v1752_v1 = vpop.f32.mrf.mxu0 }
 0x1b0   :  { %v1711_v0 = vpop.f32.mrf.mxu1 }
 0x1b1   :  { %v1712_v3 = vadd.f32 %v1711_v0, %v1671_v6  ;;  %v1754_v4 = vpop.f32.mrf.mxu0 }
 0x1b2   :  { %v1713_v35 = vpop.f32.mrf.mxu1 }
 0x1b3   :  { %v1714_v5 = vadd.f32 %v1713_v35, %v1673_v2  ;;  %v1753_v8 = vadd.f32 %v1752_v1, %v1712_v3  ;;  %v1756_v10 = vpop.f32.mrf.mxu0 }
 0x1b4   :  { %v1715_v9 = vpop.f32.mrf.mxu1 }
 0x1b5   :  { %v1755_v11 = vadd.f32 %v1754_v4, %v1714_v5  ;;  %v1757_v13 = vpop.f32.mrf.mxu0  ;;  %v1761_v17 = vpack.c.bf16 %v1753_v8, %v1753_v8 }
 0x1b6   :  { %v1716_v12 = vpop.f32.mrf.mxu1 }
 0x1b7   :  { %v1762_v14 = vpack.c.bf16 %v1755_v11, %v1755_v11 }
 0x1b9   :  { %2098 = vmatprep.mubr.bf16.mxu1 %v1762_v14 }
 0x1ba   :  { %2099 = vmatmul.mubr.bf16.vlgmr.msra.gmra.mxu1 %v1761_v17 }
 0x219   :  { %v2402_v18 = vpop.f32.mrf.mxu0 }
 0x21b   :  { %v2403_v19 = vpop.f32.mrf.mxu0 }
 0x21c   :  { %v2404_v20 = vadd.f32 %v2403_v19, %v2402_v18 }
 0x21d   :  { %v2405_v21 = vpop.f32.mrf.mxu0 }
 0x21e   :  { %v2061_v26 = vadd.f32 %v2404_v20, %v2353_v23 }
 0x21f   :  { %v2406_v22 = vpop.f32.mrf.mxu0 }
 0x27a   :  { %v2424_v24 = vpop.f32.mrf.mxu1 }
 0x27c   :  { %v2425_v25 = vpop.f32.mrf.mxu1 }
 0x27d   :  { %v2426_v27 = vadd.f32 %v2425_v25, %v2424_v24 }
 0x27e   :  { %v2427_v28 = vpop.f32.mrf.mxu1 }
 0x27f   :  { %v2101_v29 = vadd.f32 %v2426_v27, %v2061_v26 }
 0x280   :  { %v2428_v30 = vpop.f32.mrf.mxu1 }
 0x281   :  { %2106 = vst [vmem:[#allocation5] sm:$0xff] %v2101_v29 }
 0x282   :  { %2841 = shalt.err (!%p2838_p9)
}
 0x283   :  { %2116 = dma.vmem_to_hbm [thread:$0]  %s2114_s19, 128, %s3050_s5, [#allocation4]  }
 0x284   :  { %2852 = dma.done.wait [#allocation4], 128  }
 0x285   :  { %2853 = vsyncadd [#allocation4], 4294967168 }
 0x286   :  { %2120 = vsyncpa [#allocation3], 1 }
 0x287   :  { %2121 = vsyncpa [#allocation4], 1 }

</bundles_post_ra>
